<compile_context>
chip_gen: v7x
topology: tpu7x:2x2x1
jax: 0.10.0
libtpu: 0.0.40
codegen_flags: <defaults>
</compile_context>

<pallas_src>
import functools

import jax
import jax.numpy as jnp
from jax.experimental import pallas as pl
from jax.experimental.pallas import tpu as pltpu


def _round_up(x: int, m: int) -> int:
    return ((x + m - 1) // m) * m


def _vmem_capacity_bytes() -> int:
    """Physical VMEM per TensorCore; fall back to the smallest (v7x) figure."""
    try:
        return int(pltpu.get_tpu_info().vmem_capacity_bytes)
    except Exception:
        return 64 * 1024 * 1024


def _ce_normal_kernel(pred_ref, labels_ref, sw_ref, out_ref,
                      m_ref, l_ref, t_ref, *,
                      n_valid, c_valid, tile_n, tile_c, mask_classes):
    """Grid = (batch blocks, class blocks).

    pred_ref   : [tile_n, tile_c]  logits (native dtype)        VMEM
    labels_ref : [tile_n, 1]       int32 class indices          VMEM
    sw_ref     : [tile_n, 1]       f32 per-sample weight        VMEM
    out_ref    : [1, 128]          f32, lane0=num, lane1=den    VMEM
    m/l/t_ref  : [tile_n, 1]       f32 running max / sum-exp / target logit
    """
    i = pl.program_id(0)
    j = pl.program_id(1)
    nc = pl.num_programs(1)

    @pl.when(j == 0)
    def _init():
        m_ref[...] = jnp.full(m_ref.shape, -jnp.inf, jnp.float32)
        l_ref[...] = jnp.zeros(l_ref.shape, jnp.float32)
        t_ref[...] = jnp.zeros(t_ref.shape, jnp.float32)

    p = pred_ref[...].astype(jnp.float32)            # [T, Cb]
    lbl = labels_ref[...]                            # [T, 1] int32
    t, cb = p.shape

    # Global class ids of this class block (reused for tail mask + target gather).
    cls_ids = j * tile_c + jax.lax.broadcasted_iota(jnp.int32, (t, cb), 1)

    if mask_classes:
        # Ragged last class block: tail columns hold garbage -> force a
        # huge-negative logit so max/exp ignore them (exp underflows to 0 in f32).
        p = jnp.where(cls_ids < c_valid, p, jnp.float32(-3.4e38))

    # Online log-sum-exp update along the class grid axis.
    m_old = m_ref[...]
    m_new = jnp.maximum(m_old, jnp.max(p, axis=1, keepdims=True))
    alpha = jnp.exp(m_old - m_new)
    l_ref[...] = alpha * l_ref[...] + jnp.sum(jnp.exp(p - m_new), axis=1,
                                              keepdims=True)
    m_ref[...] = m_new

    # Target-logit gather via iota compare.  Valid labels are < c_valid, so
    # garbage tail columns (cls_ids >= c_valid) can never match.
    t_ref[...] += jnp.sum(jnp.where(cls_ids == lbl, p, 0.0), axis=1,
                          keepdims=True)

    @pl.when(j == nc - 1)
    def _finalize():
        sw = sw_ref[...].astype(jnp.float32)                            # [T,1]
        # Row-validity mask handles the ragged last batch block (no wrapper
        # padding of pred).  jnp.where SELECTS (does not multiply), so
        # garbage/NaN rows contribute exactly 0.
        row_ids = i * tile_n + jax.lax.broadcasted_iota(jnp.int32, (t, 1), 0)
        valid = row_ids < n_valid
        lse = m_ref[...] + jnp.log(l_ref[...])
        per_sample = jnp.where(valid, sw * (lse - t_ref[...]), 0.0)
        sw_masked = jnp.where(valid, sw, 0.0)
        num = jnp.sum(per_sample)
        den = jnp.sum(sw_masked)
        lane = jax.lax.broadcasted_iota(jnp.int32, (1, 128), 1)
        out_ref[...] = jnp.where(lane == 0, num, jnp.where(lane == 1, den, 0.0))


def ce_normal(pred: jax.Array, labels: jax.Array, class_weight: jax.Array,
              scale: float = 1.0,
              tile_n: int | None = None, tile_c: int | None = None) -> jax.Array:
    """Pallas implementation of CE_normal.forward (the module uses scale=1)."""
    n, c = pred.shape
    labels = labels.astype(jnp.int32)
    itemsize = jnp.dtype(pred.dtype).itemsize

    # Per-sample weight gather in the wrapper (tiny, keeps XLU budget in-kernel).
    # TODO(synk): PyTorch casts weights to float64; TPU accumulates in float32.
    sample_w = class_weight.astype(jnp.float32)[labels]                    # [N]

    # --- VMEM-aware tiling ------------------------------------------------------
    vmem_cap = _vmem_capacity_bytes()
    vmem_limit = max(32 * 1024 * 1024, min(vmem_cap // 2, 96 * 1024 * 1024))
    budget = int(vmem_limit * 0.85)

    def per_row_bytes(ct: int) -> int:
        ct_lane = _round_up(ct, 128)
        # 2x double-buffered pred tile + ~6 f32 [T,Cb] intermediates
        # + labels/weights buffers, [T,1] scratch and [T,1] temporaries.
        return ct_lane * (2 * itemsize + 24) + 16 * 128 * 4

    if tile_c is None:
        if per_row_bytes(c) * 8 <= budget:
            tile_c = c                                  # single class block
        else:
            # Enormous C: class-tile with online softmax over the class grid axis.
            tn_guess = 256 if n >= 256 else max(8, _round_up(n, 8))
            ct_lane = (budget // tn_guess - 16 * 128 * 4) // (2 * itemsize + 24)
            tile_c = max(128, (ct_lane // 128) * 128)
            tile_c = min(tile_c, _round_up(c, 128))

    if tile_n is None:
        tile_n = budget // per_row_bytes(tile_c)
        tile_n = max(8, min(4096, (tile_n // 8) * 8))
    # Keep the batch block inside the array extent where possible.
    if n < 8:
        tile_n = n                                      # block == full batch dim
    else:
        tile_n = max(8, min(tile_n, (n // 8) * 8))

    nb = pl.cdiv(n, tile_n)
    ncb = pl.cdiv(c, tile_c)
    mask_classes = (ncb * tile_c != c)

    labels2d = labels.reshape(n, 1)
    sw2d = sample_w.reshape(n, 1)

    kernel = functools.partial(_ce_normal_kernel, n_valid=n, c_valid=c,
                               tile_n=tile_n, tile_c=tile_c,
                               mask_classes=mask_classes)

    cost = pl.CostEstimate(
        flops=5 * n * c,
        transcendentals=n * c,
        bytes_accessed=n * c * itemsize + 2 * n * 4 + nb * 128 * 4,
    )

    partials = pl.pallas_call(
        kernel,
        out_shape=jax.ShapeDtypeStruct((nb, 128), jnp.float32),
        grid=(nb, ncb),
        in_specs=[
            pl.BlockSpec((tile_n, tile_c), lambda i, j: (i, j)),  # pred (streamed)
            pl.BlockSpec((tile_n, 1), lambda i, j: (i, 0)),       # labels
            pl.BlockSpec((tile_n, 1), lambda i, j: (i, 0)),       # per-sample w
        ],
        out_specs=pl.BlockSpec((1, 128), lambda i, j: (i, 0)),
        scratch_shapes=[
            pltpu.VMEM((tile_n, 1), jnp.float32),   # running max
            pltpu.VMEM((tile_n, 1), jnp.float32),   # running sum(exp)
            pltpu.VMEM((tile_n, 1), jnp.float32),   # running target logit
        ],
        compiler_params=pltpu.CompilerParams(
            dimension_semantics=("parallel", "arbitrary"),
            vmem_limit_bytes=int(vmem_limit),
        ),
        cost_estimate=cost,
    )(pred, labels2d, sw2d)

    num = jnp.sum(partials[:, 0])
    den = jnp.sum(partials[:, 1])
    return (num / den) * jnp.float32(scale)


def _reference(pred, labels, class_weight, scale=1.0):
    """Pure-JAX reference mirroring the PyTorch semantics."""
    logp = jax.nn.log_softmax(pred.astype(jnp.float32), axis=1)
    onehot = jax.nn.one_hot(labels, pred.shape[1], dtype=jnp.float32)
    w = class_weight.astype(jnp.float32)[labels]
    ce = -jnp.sum(w[:, None] * onehot * logp, axis=1)
    return (ce.sum() / w.sum()) * scale


if __name__ == "__main__":
    key = jax.random.PRNGKey(0)
    k_pred, k_lbl = jax.random.split(key)

    # Main case (matches the module defaults: num_classes=32, batch=8).
    num_classes, batch = 32, 8
    pred = jax.random.normal(k_pred, (batch, num_classes), dtype=jnp.float32)
    labels = jax.random.randint(k_lbl, (batch,), 0, num_classes, dtype=jnp.int32)
    class_weight = 0.5 + jnp.arange(num_classes, dtype=jnp.float32) / num_classes

    loss = ce_normal(pred, labels, class_weight, scale=1.0)
    jax.block_until_ready(loss)
    ref = _reference(pred, labels, class_weight, scale=1.0)
    assert jnp.allclose(loss, ref, rtol=1e-5, atol=1e-5), (loss, ref)

    # Ragged batch + non-128 class count (exercises the no-pad row mask).
    n2, c2 = 10, 33
    p2 = jax.random.normal(jax.random.PRNGKey(1), (n2, c2), dtype=jnp.float32)
    l2 = jax.random.randint(jax.random.PRNGKey(2), (n2,), 0, c2, dtype=jnp.int32)
    w2 = 0.25 + jnp.arange(c2, dtype=jnp.float32) / c2
    out2 = ce_normal(p2, l2, w2)
    jax.block_until_ready(out2)
    assert jnp.allclose(out2, _reference(p2, l2, w2), rtol=1e-5, atol=1e-5)

    # Class-tiled online-softmax path (forced small tile_c, ragged class tail).
    n3, c3 = 8, 300
    p3 = jax.random.normal(jax.random.PRNGKey(3), (n3, c3), dtype=jnp.float32)
    l3 = jax.random.randint(jax.random.PRNGKey(4), (n3,), 0, c3, dtype=jnp.int32)
    w3 = 0.5 + jnp.arange(c3, dtype=jnp.float32) / c3
    out3 = ce_normal(p3, l3, w3, tile_c=128)
    jax.block_until_ready(out3)
    assert jnp.allclose(out3, _reference(p3, l3, w3), rtol=1e-5, atol=1e-5)

    print("KERNEL_OK")
</pallas_src>

<mosaic_0001>
module attributes {stable_mosaic.version = 11 : i64} {
  func.func @_ce_normal_kernel(%arg0: i32, %arg1: i32, %arg2: memref<8x32xf32, #tpu.memory_space<vmem>>, %arg3: memref<8x1xi32, #tpu.memory_space<vmem>>, %arg4: memref<8x1xf32, #tpu.memory_space<vmem>>, %arg5: memref<1x128xf32, #tpu.memory_space<vmem>>, %arg6: memref<8x1xf32, #tpu.memory_space<vmem>>, %arg7: memref<8x1xf32, #tpu.memory_space<vmem>>, %arg8: memref<8x1xf32, #tpu.memory_space<vmem>>) attributes {dimension_semantics = [#tpu.dimension_semantics<parallel>, #tpu.dimension_semantics<arbitrary>], iteration_bounds = array<i64: 1, 1>, scalar_prefetch = 0 : i64, scratch_operands = 3 : i64, tpu.core_type = #tpu.core_type<tc>, window_params = [{transform_indices = @transform_0, window_bounds = array<i64: 8, 32>}, {transform_indices = @transform_1, window_bounds = array<i64: 8, 1>}, {transform_indices = @transform_2, window_bounds = array<i64: 8, 1>}, {transform_indices = @transform_3, window_bounds = array<i64: 1, 128>}]} {
    %c0_i32 = arith.constant 0 : i32
    %0 = arith.cmpi eq, %arg1, %c0_i32 : i32
    %1 = arith.extui %0 : i1 to i32
    %c0_i32_0 = arith.constant 0 : i32
    %2 = arith.cmpi ne, %1, %c0_i32_0 : i32
    scf.if %2 {
      %cst_21 = arith.constant 0xFF800000 : f32
      %37 = vector.broadcast %cst_21 : f32 to vector<8x1xf32>
      %c0_22 = arith.constant 0 : index
      %c0_23 = arith.constant 0 : index
      %38 = vector.load %arg6[%c0_22, %c0_23] : memref<8x1xf32, #tpu.memory_space<vmem>>, vector<8x1xf32>
      tpu.vector_store %arg6[%c0_22, %c0_23], %37 {strides = array<i32>} : memref<8x1xf32, #tpu.memory_space<vmem>>, vector<8x1xf32>,
      %cst_24 = arith.constant 0.000000e+00 : f32
      %39 = vector.broadcast %cst_24 : f32 to vector<8x1xf32>
      %c0_25 = arith.constant 0 : index
      %c0_26 = arith.constant 0 : index
      %40 = vector.load %arg7[%c0_25, %c0_26] : memref<8x1xf32, #tpu.memory_space<vmem>>, vector<8x1xf32>
      tpu.vector_store %arg7[%c0_25, %c0_26], %39 {strides = array<i32>} : memref<8x1xf32, #tpu.memory_space<vmem>>, vector<8x1xf32>,
      %cst_27 = arith.constant 0.000000e+00 : f32
      %41 = vector.broadcast %cst_27 : f32 to vector<8x1xf32>
      %c0_28 = arith.constant 0 : index
      %c0_29 = arith.constant 0 : index
      %42 = vector.load %arg8[%c0_28, %c0_29] : memref<8x1xf32, #tpu.memory_space<vmem>>, vector<8x1xf32>
      tpu.vector_store %arg8[%c0_28, %c0_29], %41 {strides = array<i32>} : memref<8x1xf32, #tpu.memory_space<vmem>>, vector<8x1xf32>,
    } else {
    }
    %c0 = arith.constant 0 : index
    %c0_1 = arith.constant 0 : index
    %3 = vector.load %arg2[%c0, %c0_1] : memref<8x32xf32, #tpu.memory_space<vmem>>, vector<8x32xf32>
    %c0_2 = arith.constant 0 : index
    %c0_3 = arith.constant 0 : index
    %4 = vector.load %arg3[%c0_2, %c0_3] : memref<8x1xi32, #tpu.memory_space<vmem>>, vector<8x1xi32>
    %c32_i32 = arith.constant 32 : i32
    %5 = arith.muli %arg1, %c32_i32 : i32
    %6 = tpu.iota {dimensions = array<i32: 1>} : vector<8x32xi32>
    %7 = vector.broadcast %5 : i32 to vector<8x32xi32>
    %8 = arith.addi %7, %6 : vector<8x32xi32>
    %c0_4 = arith.constant 0 : index
    %c0_5 = arith.constant 0 : index
    %9 = vector.load %arg6[%c0_4, %c0_5] : memref<8x1xf32, #tpu.memory_space<vmem>>, vector<8x1xf32>
    %cst = arith.constant dense<0xFF800000> : vector<8xf32>
    %10 = vector.multi_reduction <maximumf>, %3, %cst [1] : vector<8x32xf32> to vector<8xf32>
    %11 = vector.shape_cast %10 : vector<8xf32> to vector<8x1xf32>
    %12 = arith.maximumf %9, %11 : vector<8x1xf32>
    %13 = arith.subf %9, %12 : vector<8x1xf32>
    %14 = math.exp %13 : vector<8x1xf32>
    %c0_6 = arith.constant 0 : index
    %c0_7 = arith.constant 0 : index
    %15 = vector.load %arg7[%c0_6, %c0_7] : memref<8x1xf32, #tpu.memory_space<vmem>>, vector<8x1xf32>
    %16 = arith.mulf %14, %15 : vector<8x1xf32>
    %17 = vector.broadcast %12 : vector<8x1xf32> to vector<8x32xf32>
    %18 = arith.subf %3, %17 : vector<8x32xf32>
    %19 = math.exp %18 : vector<8x32xf32>
    %cst_8 = arith.constant dense<0.000000e+00> : vector<8xf32>
    %20 = vector.multi_reduction <add>, %19, %cst_8 [1] : vector<8x32xf32> to vector<8xf32>
    %21 = vector.shape_cast %20 : vector<8xf32> to vector<8x1xf32>
    %22 = arith.addf %16, %21 : vector<8x1xf32>
    %c0_9 = arith.constant 0 : index
    %c0_10 = arith.constant 0 : index
    %23 = vector.load %arg7[%c0_9, %c0_10] : memref<8x1xf32, #tpu.memory_space<vmem>>, vector<8x1xf32>
    tpu.vector_store %arg7[%c0_9, %c0_10], %22 {strides = array<i32>} : memref<8x1xf32, #tpu.memory_space<vmem>>, vector<8x1xf32>,
    %c0_11 = arith.constant 0 : index
    %c0_12 = arith.constant 0 : index
    %24 = vector.load %arg6[%c0_11, %c0_12] : memref<8x1xf32, #tpu.memory_space<vmem>>, vector<8x1xf32>
    tpu.vector_store %arg6[%c0_11, %c0_12], %12 {strides = array<i32>} : memref<8x1xf32, #tpu.memory_space<vmem>>, vector<8x1xf32>,
    %c0_13 = arith.constant 0 : index
    %c0_14 = arith.constant 0 : index
    %25 = vector.load %arg8[%c0_13, %c0_14] : memref<8x1xf32, #tpu.memory_space<vmem>>, vector<8x1xf32>
    %26 = vector.broadcast %4 : vector<8x1xi32> to vector<8x32xi32>
    %27 = arith.cmpi eq, %8, %26 : vector<8x32xi32>
    %cst_15 = arith.constant 0.000000e+00 : f32
    %28 = vector.broadcast %cst_15 : f32 to vector<8x32xf32>
    %29 = arith.select %27, %3, %28 : vector<8x32xi1>, vector<8x32xf32>
    %cst_16 = arith.constant dense<0.000000e+00> : vector<8xf32>
    %30 = vector.multi_reduction <add>, %29, %cst_16 [1] : vector<8x32xf32> to vector<8xf32>
    %31 = vector.shape_cast %30 : vector<8xf32> to vector<8x1xf32>
    %32 = arith.addf %25, %31 : vector<8x1xf32>
    %c0_17 = arith.constant 0 : index
    %c0_18 = arith.constant 0 : index
    %33 = vector.load %arg8[%c0_17, %c0_18] : memref<8x1xf32, #tpu.memory_space<vmem>>, vector<8x1xf32>
    tpu.vector_store %arg8[%c0_17, %c0_18], %32 {strides = array<i32>} : memref<8x1xf32, #tpu.memory_space<vmem>>, vector<8x1xf32>,
    %c0_i32_19 = arith.constant 0 : i32
    %34 = arith.cmpi eq, %arg1, %c0_i32_19 : i32
    %35 = arith.extui %34 : i1 to i32
    %c0_i32_20 = arith.constant 0 : i32
    %36 = arith.cmpi ne, %35, %c0_i32_20 : i32
    scf.if %36 {
      %c0_21 = arith.constant 0 : index
      %c0_22 = arith.constant 0 : index
      %37 = vector.load %arg4[%c0_21, %c0_22] : memref<8x1xf32, #tpu.memory_space<vmem>>, vector<8x1xf32>
      %c8_i32 = arith.constant 8 : i32
      %38 = arith.muli %arg0, %c8_i32 : i32
      %39 = tpu.iota {dimensions = array<i32: 0>} : vector<8x1xi32>
      %40 = vector.broadcast %38 : i32 to vector<8x1xi32>
      %41 = arith.addi %40, %39 : vector<8x1xi32>
      %c8_i32_23 = arith.constant 8 : i32
      %42 = vector.broadcast %c8_i32_23 : i32 to vector<8x1xi32>
      %43 = arith.cmpi slt, %41, %42 : vector<8x1xi32>
      %c0_24 = arith.constant 0 : index
      %c0_25 = arith.constant 0 : index
      %44 = vector.load %arg6[%c0_24, %c0_25] : memref<8x1xf32, #tpu.memory_space<vmem>>, vector<8x1xf32>
      %c0_26 = arith.constant 0 : index
      %c0_27 = arith.constant 0 : index
      %45 = vector.load %arg7[%c0_26, %c0_27] : memref<8x1xf32, #tpu.memory_space<vmem>>, vector<8x1xf32>
      %46 = math.log %45 : vector<8x1xf32>
      %47 = arith.addf %44, %46 : vector<8x1xf32>
      %c0_28 = arith.constant 0 : index
      %c0_29 = arith.constant 0 : index
      %48 = vector.load %arg8[%c0_28, %c0_29] : memref<8x1xf32, #tpu.memory_space<vmem>>, vector<8x1xf32>
      %49 = arith.subf %47, %48 : vector<8x1xf32>
      %50 = arith.mulf %37, %49 : vector<8x1xf32>
      %cst_30 = arith.constant 0.000000e+00 : f32
      %51 = vector.broadcast %cst_30 : f32 to vector<8x1xf32>
      %52 = arith.select %43, %50, %51 : vector<8x1xi1>, vector<8x1xf32>
      %cst_31 = arith.constant 0.000000e+00 : f32
      %53 = vector.broadcast %cst_31 : f32 to vector<8x1xf32>
      %54 = arith.select %43, %37, %53 : vector<8x1xi1>, vector<8x1xf32>
      %55 = vector.shape_cast %52 : vector<8x1xf32> to vector<1x8x1xf32>
      %cst_32 = arith.constant dense<0.000000e+00> : vector<1xf32>
      %56 = vector.multi_reduction <add>, %55, %cst_32 [1, 2] : vector<1x8x1xf32> to vector<1xf32>
      %57 = vector.shape_cast %56 : vector<1xf32> to vector<1x1x1xf32>
      %58 = vector.extract %57[0, 0, 0] : f32 from vector<1x1x1xf32>
      %59 = vector.shape_cast %54 : vector<8x1xf32> to vector<1x8x1xf32>
      %cst_33 = arith.constant dense<0.000000e+00> : vector<1xf32>
      %60 = vector.multi_reduction <add>, %59, %cst_33 [1, 2] : vector<1x8x1xf32> to vector<1xf32>
      %61 = vector.shape_cast %60 : vector<1xf32> to vector<1x1x1xf32>
      %62 = vector.extract %61[0, 0, 0] : f32 from vector<1x1x1xf32>
      %63 = tpu.iota {dimensions = array<i32: 1>} : vector<1x128xi32>
      %c0_i32_34 = arith.constant 0 : i32
      %64 = vector.broadcast %c0_i32_34 : i32 to vector<1x128xi32>
      %65 = arith.cmpi eq, %63, %64 : vector<1x128xi32>
      %c1_i32 = arith.constant 1 : i32
      %66 = vector.broadcast %c1_i32 : i32 to vector<1x128xi32>
      %67 = arith.cmpi eq, %63, %66 : vector<1x128xi32>
      %cst_35 = arith.constant 0.000000e+00 : f32
      %68 = vector.broadcast %62 : f32 to vector<1x128xf32>
      %69 = vector.broadcast %cst_35 : f32 to vector<1x128xf32>
      %70 = arith.select %67, %68, %69 : vector<1x128xi1>, vector<1x128xf32>
      %71 = vector.broadcast %58 : f32 to vector<1x128xf32>
      %72 = arith.select %65, %71, %70 : vector<1x128xi1>, vector<1x128xf32>
      %c0_36 = arith.constant 0 : index
      %c0_37 = arith.constant 0 : index
      %73 = vector.load %arg5[%c0_36, %c0_37] : memref<1x128xf32, #tpu.memory_space<vmem>>, vector<1x128xf32>
      tpu.vector_store %arg5[%c0_36, %c0_37], %72 {strides = array<i32>} : memref<1x128xf32, #tpu.memory_space<vmem>>, vector<1x128xf32>,
    } else {
    }
    return
  }
  func.func @transform_0(%arg0: i32, %arg1: i32) -> (i32, i32) {
    %c0_i32 = arith.constant 0 : i32
    return %arg0, %arg1 : i32, i32
  }
  func.func @transform_1(%arg0: i32, %arg1: i32) -> (i32, i32) {
    %c0_i32 = arith.constant 0 : i32
    %c0_i32_0 = arith.constant 0 : i32
    return %arg0, %c0_i32 : i32, i32
  }
  func.func @transform_2(%arg0: i32, %arg1: i32) -> (i32, i32) {
    %c0_i32 = arith.constant 0 : i32
    %c0_i32_0 = arith.constant 0 : i32
    return %arg0, %c0_i32 : i32, i32
  }
  func.func @transform_3(%arg0: i32, %arg1: i32) -> (i32, i32) {
    %c0_i32 = arith.constant 0 : i32
    %c0_i32_0 = arith.constant 0 : i32
    return %arg0, %c0_i32 : i32, i32
  }
}

</mosaic_0001>

<bundles_post_ra>
// kernel: tpu_custom_call.1
= control target key start
LH: loop header
LB: loop body
LE: loop exit
PB: predicated region body
PF: predicated region fallthrough
CT: control target
= control target key end

     0   :  { %vm31_vm0 = vcmask 261120   ;;  %s229_s0 = inlined_call_operand.vmem [shape: f32[8,32], index: 0, kind: input, shape index: {}]   ;;  %s230_s1 = inlined_call_operand.vmem [shape: s32[8,1], index: 1, kind: input, shape index: {}]   ;;  %s231_s2 = inlined_call_operand.vmem [shape: f32[8,1], index: 2, kind: input, shape index: {}]   ;;  %s232_s3 = inlined_call_operand.hbm [shape: f32[1,128], index: 3, kind: output, shape index: {}]  }
   0x1   :  { %v23_v0 = vld [vmem:[%s229_s0] sm:$0xff] }
   0x2   :  { %8 = vsyncpa [#allocation6], 0  ;;  %v32_v1 = vsel %vm31_vm0, %v23_v0, -inf  ;;  %vm19_vm1 = vcmask 7168   ;;  %v168_v2 = vmov -inf   ;;  %v169_v3 = vmov 0  }
   0x3   :  { %33 = vmax.xlane.f32.xlu0 %v32_v1  ;;  %20 = vst.msk [vmem:[#allocation2] sm:$0xff] %vm19_vm1, %v168_v2  ;;  %137 = vset.pattern.permute.xlu1 %v169_v3  ;;  %v24_v4 = vld [vmem:[%s230_s1] sm:$0xff]  ;;  %v170_v5 = vmov 0.0   ;;  %v26_v13 = vlaneseq  ;;  %s171_s16 = smov [#allocation5]  }
   0x4   :  { %136 = vset.pattern.permute.xlu0 %v169_v3  ;;  %58 = vperm.xlu1 %137, %v24_v4   ;;  %21 = vst.msk [vmem:[#allocation3] sm:$0xff] %vm19_vm1, %v170_v5  ;;  %22 = vst.msk [vmem:[#allocation4] sm:$0xff] %vm19_vm1, %v170_v5  ;;  %v70_v20 = vld [vmem:[%s231_s2] sm:$0xff]  ;;  %s120_s17 = sshll.u32 %s171_s16, 4  ;;  %s121_s17 = int_to_ptr.vmem [resolvable:$true] %s120_s17 }
   0x5   :  { %v203_v14 = vand.u32 127, %v26_v13  ;;  %v97_v21 = vsel %vm19_vm1, %v70_v20, 0.0  ;;  %s144_s19 = scalar_lea.vmem %s121_s17, 16  ;;  %s148_s20 = scalar_lea.vmem %s121_s17, 32 }
   0x6   :  { %p145_p0 = scmp.ne.s32.totalorder %s121_s17, %s144_s19  ;;  %p149_p1 = scmp.lt.s32.totalorder %s121_s17, %s121_s17 }
   0x7   :  { %vm108_vm3 = vcmp.eq.s32.totalorder %v203_v14, 1  ;;  %vm107_vm4 = vcmp.eq.s32.totalorder %v203_v14, 0  ;;  %p150_p2 = scmp.lt.s32.totalorder %s148_s20, %s144_s19 }
   0x9   :  { %p151_p3 = por %p150_p2, %p149_p1 }
   0xa   :  { %v30_v6 = vld [vmem:[#allocation2] sm:$0xff] }
   0xb   :  { %v39_v24 = vld [vmem:[#allocation3] sm:$0xff]  ;;  %v56_v28 = vld [vmem:[#allocation4] sm:$0xff]  ;;  %p152_p4 = pnand %p151_p3, %p145_p0 }
  0x83   :  { %v59_v15 = vpop.permute.xlu1 %58 }
  0x84   :  { %vm60_vm2 = vcmp.eq.s32.totalorder %v203_v14, %v59_v15 }
  0x85   :  { %v61_v17 = vsel %vm60_vm2, %v23_v0, 0.0 }
  0x86   :  { %v62_v19 = vsel %vm31_vm0, %v61_v17, 0.0 }
  0x90   :  { %v34_v7 = vpop.xlane.xlu0 %33 }
  0x91   :  { %v35_v8 = vmax.f32 %v30_v6, %v34_v7 }
  0x93   :  { %v36_v9 = vsub.f32 %v30_v6, %v35_v8  ;;  %55 = vst.msk [vmem:[#allocation2] sm:$0xff] %vm19_vm1, %v35_v8  ;;  %43 = vperm.xlu0 %136, %v35_v8  }
  0x95   :  { %v37_v22 = vmul.f32 1.442695, %v36_v9 }
  0x9a   :  { %v77_v34 = vld [vmem:[#allocation2] sm:$0xff] }
  0xb2   :  { %98 = vadd.xlane.f32.xlu0 %v97_v21 }
 0x112   :  { %v44_v10 = vpop.permute.xlu0 %43 }
 0x113   :  { %v46_v11 = vsub.f32 %v23_v0, %v44_v10 }
 0x115   :  { %v47_v12 = vmul.f32 1.442695, %v46_v11 }
 0x117   :  { %138 = vpow2.f32 %v47_v12 }
 0x118   :  { %140 = vpow2.f32 %v37_v22 }
 0x121   :  { %v139_v16 = vpop.eup %138 }
 0x122   :  { %v49_v18 = vsel %vm31_vm0, %v139_v16, 0.0  ;;  %v141_v23 = vpop.eup %140 }
 0x123   :  { %50 = vadd.xlane.f32.xlu1 %v49_v18  ;;  %v40_v25 = vmul.f32 %v141_v23, %v39_v24 }
 0x127   :  { %63 = vadd.xlane.f32.xlu1 %v62_v19 }
 0x13f   :  { %v99_v40 = vpop.xlane.xlu0 %98 }
 0x140   :  { %v100_v41 = vrot.slane %v99_v40, 4 }
 0x142   :  { %v101_v42 = vadd.f32 %v100_v41, %v99_v40 }
 0x144   :  { %v102_v43 = vrot.slane %v101_v42, 2 }
 0x146   :  { %v103_v47 = vadd.f32 %v102_v43, %v101_v42 }
 0x148   :  { %v104_v50 = vrot.slane %v103_v47, 1 }
 0x14a   :  { %v105_v53 = vadd.f32 %v104_v50, %v103_v47 }
 0x1b0   :  { %v51_v26 = vpop.xlane.xlu1 %50 }
 0x1b1   :  { %v52_v27 = vadd.f32 %v51_v26, %v40_v25 }
 0x1b3   :  { %54 = vst.msk [vmem:[#allocation3] sm:$0xff] %vm19_vm1, %v52_v27 }
 0x1b4   :  { %v64_v29 = vpop.xlane.xlu1 %63 }
 0x1b5   :  { %v65_v30 = vadd.f32 %v64_v29, %v56_v28 }
 0x1b7   :  { %66 = vst.msk [vmem:[#allocation4] sm:$0xff] %vm19_vm1, %v65_v30 }
 0x1ba   :  { %v78_v31 = vld [vmem:[#allocation3] sm:$0xff] }
 0x1bb   :  { %142 = vlog2.f32 %v78_v31 }
 0x1be   :  { %v82_v35 = vld [vmem:[#allocation4] sm:$0xff] }
 0x1c5   :  { %v143_v32 = vpop.eup %142 }
 0x1c6   :  { %v80_v33 = vmul.f32 0.6931472, %v143_v32 }
 0x1c8   :  { %v81_v36 = vadd.f32 %v80_v33, %v77_v34 }
 0x1ca   :  { %v83_v37 = vsub.f32 %v81_v36, %v82_v35 }
 0x1cc   :  { %v84_v38 = vmul.f32 %v83_v37, %v70_v20 }
 0x1ce   :  { %v87_v39 = vsel %vm19_vm1, %v84_v38, 0.0 }
 0x1cf   :  { %88 = vadd.xlane.f32.xlu1 %v87_v39 }
 0x25c   :  { %v89_v44 = vpop.xlane.xlu1 %88 }
 0x25d   :  { %v90_v45 = vrot.slane %v89_v44, 4 }
 0x25f   :  { %v91_v46 = vadd.f32 %v90_v45, %v89_v44 }
 0x261   :  { %v92_v48 = vrot.slane %v91_v46, 2 }
 0x263   :  { %v93_v49 = vadd.f32 %v92_v48, %v91_v46 }
 0x265   :  { %v94_v51 = vrot.slane %v93_v49, 1 }
 0x267   :  { %v95_v52 = vadd.f32 %v94_v51, %v93_v49 }
 0x269   :  { %128 = vpush %v95_v52 }
 0x26a   :  { %130 = vpush %v105_v53 }
 0x29a   :  { %s129_s2 = spop %128 }
 0x29b   :  { %v111_v54 = vstv %s129_s2  ;;  %s131_s18 = spop %130 }
 0x29c   :  { %v109_v55 = vstv %s131_s18 }
 0x29d   :  { %v110_v56 = vsel %vm108_vm3, %v109_v55, 0.0 }
 0x29e   :  { %v112_v57 = vsel %vm107_vm4, %v111_v54, %v110_v56 }
 0x29f   :  { %113 = vst [vmem:[#allocation5] sm:$0x1] %v112_v57 }
 0x2a0   :  { %155 = shalt.err (!%p152_p4)
}
 0x2a1   :  { %s156_s23 = scalar_lea.hbm %s232_s3, 16 }
 0x2a2   :  { %p157_p5 = scmp.ne.s32.totalorder %s232_s3, %s156_s23  ;;  %p160_p6 = scmp.lt.u32.totalorder %s156_s23, %s232_s3 }
 0x2a4   :  { %p162_p7 = pnand %p160_p6, %p157_p5 }
 0x2a6   :  { %165 = shalt.err (!%p162_p7)
}
 0x2a7   :  { %123 = dma.vmem_to_hbm [thread:$0]  %s121_s17, 16, %s232_s3, [#allocation6]  }
 0x2a8   :  { %166 = dma.done.wait [#allocation6], 16  }
 0x2a9   :  { %167 = vsyncadd [#allocation6], 4294967280 }
 0x2aa   :  { %127 = vsyncpa [#allocation6], 1 }

</bundles_post_ra>
